<compile_context>
chip_gen: v6e
topology: v6e:2x2x1
jax: 0.10.0
libtpu: 0.0.40
codegen_flags: <defaults>
</compile_context>

<pallas_src>
import jax
import jax.numpy as jnp
from jax.experimental import pallas as pl
from jax.experimental.pallas import tpu as pltpu

BN_EPS = 1e-5
LANE = 128


def _round_up(n, m=LANE):
    return ((n + m - 1) // m) * m


# ---------------------------------------------------------------------------
# Fused kernel
# ---------------------------------------------------------------------------
def _relu_bn(z, gamma, beta):
    """ReLU followed by BatchNorm1d (train mode), folded to one scale/shift."""
    a = jnp.maximum(z, 0.0)
    mean = jnp.mean(a, axis=0, keepdims=True)
    centered = a - mean
    var = jnp.mean(centered * centered, axis=0, keepdims=True)  # biased, as torch
    scale = gamma * jax.lax.rsqrt(var + BN_EPS)                 # EUP rsqrt
    shift = beta - mean * scale
    return a * scale + shift                                    # single FMA over (B, N)


def fcnn_fused_kernel(x_ref,
                      w1_ref, b1_ref, g1_ref, be1_ref,
                      w2_ref, b2_ref, g2_ref, be2_ref,
                      w3_ref, b3_ref,
                      o_ref):
    """Whole 3-layer FCNN forward; all activations stay in vregs/VMEM."""
    x = x_ref[...]
    # block 1: Linear -> ReLU -> BN
    h = jnp.dot(x, w1_ref[...], preferred_element_type=jnp.float32) + b1_ref[...]
    h = _relu_bn(h, g1_ref[...], be1_ref[...])
    # block 2: Linear -> ReLU -> BN   (output width zero-padded to 128 lanes)
    h = jnp.dot(h, w2_ref[...], preferred_element_type=jnp.float32) + b2_ref[...]
    h = _relu_bn(h, g2_ref[...], be2_ref[...])
    # block 3: plain Linear            (output width zero-padded to 128 lanes)
    y = jnp.dot(h, w3_ref[...], preferred_element_type=jnp.float32) + b3_ref[...]
    o_ref[...] = y.astype(o_ref.dtype)


# ---------------------------------------------------------------------------
# Parameter construction (deterministic, mimics torch defaults) + lane padding
# ---------------------------------------------------------------------------
def init_fcnn_params(key, input_size, output_size, n_layers=3):
    assert n_layers == 3, "fused kernel is specialized to the module default n_layers=3"
    layer_dims = []
    for i in range(n_layers):
        fan_in = input_size // 2 ** i
        fan_out = input_size // 2 ** (i + 1) if i != n_layers - 1 else output_size
        layer_dims.append((fan_in, fan_out))

    params = []
    for i, (fan_in, fan_out) in enumerate(layer_dims):
        key, kw, kb = jax.random.split(key, 3)
        bound = 1.0 / (fan_in ** 0.5)
        # torch nn.Linear default init: U(-1/sqrt(fan_in), 1/sqrt(fan_in))
        w = jax.random.uniform(kw, (fan_in, fan_out), jnp.float32, -bound, bound)
        b = jax.random.uniform(kb, (1, fan_out), jnp.float32, -bound, bound)

        in_pad = _round_up(fan_in)
        out_pad = _round_up(fan_out)
        # zero-pad weights/bias to lane-dense shapes; padded rows/cols contribute 0
        w_p = jnp.zeros((in_pad, out_pad), jnp.float32).at[:fan_in, :fan_out].set(w)
        b_p = jnp.zeros((1, out_pad), jnp.float32).at[:, :fan_out].set(b)

        if i != n_layers - 1:
            # BatchNorm1d defaults: weight=1, bias=0.  Padded channels keep
            # gamma=1/beta=0 so their (all-zero) activations normalize to 0.
            g_p = jnp.ones((1, out_pad), jnp.float32)
            be_p = jnp.zeros((1, out_pad), jnp.float32)
            params.append((w_p, b_p, g_p, be_p))
        else:
            params.append((w_p, b_p))
    return params


# ---------------------------------------------------------------------------
# Forward wrapper: single fused pallas_call, slice padded output columns
# ---------------------------------------------------------------------------
def fcnn_forward(params, x, output_size):
    B = x.shape[0]
    y = x.reshape(B, -1).astype(jnp.float32)

    (w1, b1, g1, be1), (w2, b2, g2, be2), (w3, b3) = params
    in_pad = w1.shape[0]
    if y.shape[1] != in_pad:                      # pad input features if needed
        y = jnp.pad(y, ((0, 0), (0, in_pad - y.shape[1])))
    n_out_pad = w3.shape[1]

    vmem = pl.BlockSpec(memory_space=pltpu.MemorySpace.VMEM)
    out = pl.pallas_call(
        fcnn_fused_kernel,
        out_shape=jax.ShapeDtypeStruct((B, n_out_pad), jnp.float32),
        in_specs=[vmem] * 11,
        out_specs=vmem,
    )(y, w1, b1, g1, be1, w2, b2, g2, be2, w3, b3)

    # drop lane-padding columns before returning
    return out[:, :output_size]

# TODO(synk): if batch grows large, tile the batch axis on a grid with
# "parallel" dimension_semantics and two-pass BN statistics (sum / sum-of-squares
# accumulators); at B=8 a single fused block is optimal.


# ---------------------------------------------------------------------------
if __name__ == "__main__":
    # small shapes consistent with the module: input_size = 16*16 = 256,
    # output_size = 3, n_layers = 3  ->  256 -> 128 -> 64 -> 3
    batch = 8
    input_size = 16 * 16
    output_size = 3
    n_layers = 3

    key = jax.random.PRNGKey(0)
    kx, kp = jax.random.split(key)
    x = jax.random.normal(kx, (batch, 16, 16), jnp.float32)  # flattened inside forward

    params = init_fcnn_params(kp, input_size, output_size, n_layers)

    out = fcnn_forward(params, x, output_size)
    out = jax.block_until_ready(out)

    assert out.shape == (batch, output_size), out.shape
    assert bool(jnp.all(jnp.isfinite(out)))
    print("KERNEL_OK")
</pallas_src>

<mosaic_0001>
module attributes {stable_mosaic.version = 11 : i64} {
  func.func @fcnn_fused_kernel(%arg0: memref<8x256xf32, #tpu.memory_space<vmem>>, %arg1: memref<256x128xf32, #tpu.memory_space<vmem>>, %arg2: memref<1x128xf32, #tpu.memory_space<vmem>>, %arg3: memref<1x128xf32, #tpu.memory_space<vmem>>, %arg4: memref<1x128xf32, #tpu.memory_space<vmem>>, %arg5: memref<128x128xf32, #tpu.memory_space<vmem>>, %arg6: memref<1x128xf32, #tpu.memory_space<vmem>>, %arg7: memref<1x128xf32, #tpu.memory_space<vmem>>, %arg8: memref<1x128xf32, #tpu.memory_space<vmem>>, %arg9: memref<128x128xf32, #tpu.memory_space<vmem>>, %arg10: memref<1x128xf32, #tpu.memory_space<vmem>>, %arg11: memref<8x128xf32, #tpu.memory_space<vmem>>) attributes {dimension_semantics = [], scalar_prefetch = 0 : i64, scratch_operands = 0 : i64, tpu.core_type = #tpu.core_type<tc>} {
    %c0 = arith.constant 0 : index
    %c0_0 = arith.constant 0 : index
    %0 = vector.load %arg0[%c0, %c0_0] : memref<8x256xf32, #tpu.memory_space<vmem>>, vector<8x256xf32>
    %c0_1 = arith.constant 0 : index
    %c0_2 = arith.constant 0 : index
    %1 = vector.load %arg1[%c0_1, %c0_2] : memref<256x128xf32, #tpu.memory_space<vmem>>, vector<256x128xf32>
    %cst = arith.constant dense<0.000000e+00> : vector<8x128xf32>
    %2 = tpu.matmul %0, %1, %cst {dimension_numbers = #tpu.dot_dimension_numbers<[1], [0], [0], [1], [0, 0, 1, 1], [], []>} : vector<8x256xf32>, vector<256x128xf32>, vector<8x128xf32> -> vector<8x128xf32>
    %c0_3 = arith.constant 0 : index
    %c0_4 = arith.constant 0 : index
    %3 = vector.load %arg2[%c0_3, %c0_4] : memref<1x128xf32, #tpu.memory_space<vmem>>, vector<1x128xf32>
    %4 = vector.broadcast %3 : vector<1x128xf32> to vector<8x128xf32>
    %5 = arith.addf %2, %4 : vector<8x128xf32>
    %c0_5 = arith.constant 0 : index
    %c0_6 = arith.constant 0 : index
    %6 = vector.load %arg3[%c0_5, %c0_6] : memref<1x128xf32, #tpu.memory_space<vmem>>, vector<1x128xf32>
    %c0_7 = arith.constant 0 : index
    %c0_8 = arith.constant 0 : index
    %7 = vector.load %arg4[%c0_7, %c0_8] : memref<1x128xf32, #tpu.memory_space<vmem>>, vector<1x128xf32>
    %cst_9 = arith.constant 0.000000e+00 : f32
    %8 = vector.broadcast %cst_9 : f32 to vector<8x128xf32>
    %9 = arith.maximumf %5, %8 : vector<8x128xf32>
    %cst_10 = arith.constant dense<0.000000e+00> : vector<128xf32>
    %10 = vector.multi_reduction <add>, %9, %cst_10 [0] : vector<8x128xf32> to vector<128xf32>
    %11 = vector.shape_cast %10 : vector<128xf32> to vector<1x128xf32>
    %cst_11 = arith.constant 8.000000e+00 : f32
    %12 = vector.broadcast %cst_11 : f32 to vector<1x128xf32>
    %13 = arith.divf %11, %12 : vector<1x128xf32>
    %14 = vector.broadcast %13 : vector<1x128xf32> to vector<8x128xf32>
    %15 = arith.subf %9, %14 : vector<8x128xf32>
    %16 = arith.mulf %15, %15 : vector<8x128xf32>
    %cst_12 = arith.constant dense<0.000000e+00> : vector<128xf32>
    %17 = vector.multi_reduction <add>, %16, %cst_12 [0] : vector<8x128xf32> to vector<128xf32>
    %18 = vector.shape_cast %17 : vector<128xf32> to vector<1x128xf32>
    %cst_13 = arith.constant 8.000000e+00 : f32
    %19 = vector.broadcast %cst_13 : f32 to vector<1x128xf32>
    %20 = arith.divf %18, %19 : vector<1x128xf32>
    %cst_14 = arith.constant 9.99999974E-6 : f32
    %21 = vector.broadcast %cst_14 : f32 to vector<1x128xf32>
    %22 = arith.addf %20, %21 : vector<1x128xf32>
    %23 = math.rsqrt %22 : vector<1x128xf32>
    %24 = arith.mulf %6, %23 : vector<1x128xf32>
    %25 = arith.mulf %13, %24 : vector<1x128xf32>
    %26 = arith.subf %7, %25 : vector<1x128xf32>
    %27 = vector.broadcast %24 : vector<1x128xf32> to vector<8x128xf32>
    %28 = arith.mulf %9, %27 : vector<8x128xf32>
    %29 = vector.broadcast %26 : vector<1x128xf32> to vector<8x128xf32>
    %30 = arith.addf %28, %29 : vector<8x128xf32>
    %c0_15 = arith.constant 0 : index
    %c0_16 = arith.constant 0 : index
    %31 = vector.load %arg5[%c0_15, %c0_16] : memref<128x128xf32, #tpu.memory_space<vmem>>, vector<128x128xf32>
    %cst_17 = arith.constant dense<0.000000e+00> : vector<8x128xf32>
    %32 = tpu.matmul %30, %31, %cst_17 {dimension_numbers = #tpu.dot_dimension_numbers<[1], [0], [0], [1], [0, 0, 1, 1], [], []>} : vector<8x128xf32>, vector<128x128xf32>, vector<8x128xf32> -> vector<8x128xf32>
    %c0_18 = arith.constant 0 : index
    %c0_19 = arith.constant 0 : index
    %33 = vector.load %arg6[%c0_18, %c0_19] : memref<1x128xf32, #tpu.memory_space<vmem>>, vector<1x128xf32>
    %34 = vector.broadcast %33 : vector<1x128xf32> to vector<8x128xf32>
    %35 = arith.addf %32, %34 : vector<8x128xf32>
    %c0_20 = arith.constant 0 : index
    %c0_21 = arith.constant 0 : index
    %36 = vector.load %arg7[%c0_20, %c0_21] : memref<1x128xf32, #tpu.memory_space<vmem>>, vector<1x128xf32>
    %c0_22 = arith.constant 0 : index
    %c0_23 = arith.constant 0 : index
    %37 = vector.load %arg8[%c0_22, %c0_23] : memref<1x128xf32, #tpu.memory_space<vmem>>, vector<1x128xf32>
    %cst_24 = arith.constant 0.000000e+00 : f32
    %38 = vector.broadcast %cst_24 : f32 to vector<8x128xf32>
    %39 = arith.maximumf %35, %38 : vector<8x128xf32>
    %cst_25 = arith.constant dense<0.000000e+00> : vector<128xf32>
    %40 = vector.multi_reduction <add>, %39, %cst_25 [0] : vector<8x128xf32> to vector<128xf32>
    %41 = vector.shape_cast %40 : vector<128xf32> to vector<1x128xf32>
    %cst_26 = arith.constant 8.000000e+00 : f32
    %42 = vector.broadcast %cst_26 : f32 to vector<1x128xf32>
    %43 = arith.divf %41, %42 : vector<1x128xf32>
    %44 = vector.broadcast %43 : vector<1x128xf32> to vector<8x128xf32>
    %45 = arith.subf %39, %44 : vector<8x128xf32>
    %46 = arith.mulf %45, %45 : vector<8x128xf32>
    %cst_27 = arith.constant dense<0.000000e+00> : vector<128xf32>
    %47 = vector.multi_reduction <add>, %46, %cst_27 [0] : vector<8x128xf32> to vector<128xf32>
    %48 = vector.shape_cast %47 : vector<128xf32> to vector<1x128xf32>
    %cst_28 = arith.constant 8.000000e+00 : f32
    %49 = vector.broadcast %cst_28 : f32 to vector<1x128xf32>
    %50 = arith.divf %48, %49 : vector<1x128xf32>
    %cst_29 = arith.constant 9.99999974E-6 : f32
    %51 = vector.broadcast %cst_29 : f32 to vector<1x128xf32>
    %52 = arith.addf %50, %51 : vector<1x128xf32>
    %53 = math.rsqrt %52 : vector<1x128xf32>
    %54 = arith.mulf %36, %53 : vector<1x128xf32>
    %55 = arith.mulf %43, %54 : vector<1x128xf32>
    %56 = arith.subf %37, %55 : vector<1x128xf32>
    %57 = vector.broadcast %54 : vector<1x128xf32> to vector<8x128xf32>
    %58 = arith.mulf %39, %57 : vector<8x128xf32>
    %59 = vector.broadcast %56 : vector<1x128xf32> to vector<8x128xf32>
    %60 = arith.addf %58, %59 : vector<8x128xf32>
    %c0_30 = arith.constant 0 : index
    %c0_31 = arith.constant 0 : index
    %61 = vector.load %arg9[%c0_30, %c0_31] : memref<128x128xf32, #tpu.memory_space<vmem>>, vector<128x128xf32>
    %cst_32 = arith.constant dense<0.000000e+00> : vector<8x128xf32>
    %62 = tpu.matmul %60, %61, %cst_32 {dimension_numbers = #tpu.dot_dimension_numbers<[1], [0], [0], [1], [0, 0, 1, 1], [], []>} : vector<8x128xf32>, vector<128x128xf32>, vector<8x128xf32> -> vector<8x128xf32>
    %c0_33 = arith.constant 0 : index
    %c0_34 = arith.constant 0 : index
    %63 = vector.load %arg10[%c0_33, %c0_34] : memref<1x128xf32, #tpu.memory_space<vmem>>, vector<1x128xf32>
    %64 = vector.broadcast %63 : vector<1x128xf32> to vector<8x128xf32>
    %65 = arith.addf %62, %64 : vector<8x128xf32>
    %c0_35 = arith.constant 0 : index
    %c0_36 = arith.constant 0 : index
    %66 = vector.load %arg11[%c0_35, %c0_36] : memref<8x128xf32, #tpu.memory_space<vmem>>, vector<8x128xf32>
    tpu.vector_store %arg11[%c0_35, %c0_36], %65 {strides = array<i32>} : memref<8x128xf32, #tpu.memory_space<vmem>>, vector<8x128xf32>,
    return
  }
}

</mosaic_0001>

<bundles_post_ra>
// kernel: tpu_custom_call.1
= control target key start
LH: loop header
LB: loop body
LE: loop exit
PB: predicated region body
PF: predicated region fallthrough
CT: control target
= control target key end

     0   :  { %16 = vsyncpa [#allocation3], 0  ;;  %s901_s0 = inlined_call_operand.hbm [shape: f32[8,256], index: 0, kind: input, shape index: {}]   ;;  %s902_s1 = inlined_call_operand.hbm [shape: f32[256,128], index: 1, kind: input, shape index: {}]   ;;  %s903_s2 = inlined_call_operand.vmem [shape: f32[1,128], index: 2, kind: input, shape index: {}]   ;;  %s904_s3 = inlined_call_operand.vmem [shape: f32[1,128], index: 3, kind: input, shape index: {}]   ;;  %s905_s4 = inlined_call_operand.vmem [shape: f32[1,128], index: 4, kind: input, shape index: {}]   ;;  %s906_s5 = inlined_call_operand.hbm [shape: f32[128,128], index: 5, kind: input, shape index: {}]   ;;  %s907_s6 = inlined_call_operand.vmem [shape: f32[1,128], index: 6, kind: input, shape index: {}]   ;;  %s908_s7 = inlined_call_operand.vmem [shape: f32[1,128], index: 7, kind: input, shape index: {}]   ;;  %s909_s8 = inlined_call_operand.vmem [shape: f32[1,128], index: 8, kind: input, shape index: {}]   ;;  %s910_s9 = inlined_call_operand.hbm [shape: f32[128,128], index: 9, kind: input, shape index: {}]   ;;  %s911_s10 = inlined_call_operand.vmem [shape: f32[1,128], index: 10, kind: input, shape index: {}]   ;;  %s912_s11 = inlined_call_operand.hbm [shape: f32[8,128], index: 11, kind: output, shape index: {}]  }
   0x1   :  { %17 = vsyncpa [#allocation6], 0 }
   0x2   :  { %18 = vsyncpa [#allocation9], 0 }
   0x3   :  { %19 = vsyncpa [#allocation4], 0  ;;  %s747_s17 = smov [#allocation5]  }
   0x4   :  { %s35_s18 = sshll.u32 %s747_s17, 4  ;;  %s36_s18 = int_to_ptr.vmem [resolvable:$true] %s35_s18 }
   0x5   :  { %s647_s19 = scalar_lea.vmem %s36_s18, 4096  ;;  %p652_p1 = scmp.lt.s32.totalorder %s36_s18, %s36_s18 }
   0x6   :  { %p648_p0 = scmp.ne.s32.totalorder %s36_s18, %s647_s19  ;;  %p653_p2 = scmp.lt.s32.totalorder %s647_s19, %s647_s19 }
   0x8   :  { %p654_p3 = por %p653_p2, %p652_p1 }
   0xa   :  { %p655_p4 = pnand %p654_p3, %p648_p0 }
   0xc   :  { %658 = shalt.err (!%p655_p4)
}
   0xd   :  { %s748_s20 = smov 128   ;;  %s749_s21 = smov 8  }
   0xe   :  { %41 = dma.hbm_to_vmem [thread:$0]  %s902_s1, 4096, %s36_s18, [#allocation6], %s748_s20, %s748_s20, %s749_s21  }
   0xf   :  { %s750_s24 = smov [#allocation2]   ;;  %s751_s26 = smov [#allocation7]  }
  0x10   :  { %s26_s25 = sshll.u32 %s750_s24, 4  ;;  %s53_s27 = sshll.u32 %s751_s26, 4  ;;  %s27_s25 = int_to_ptr.vmem [resolvable:$true] %s26_s25  ;;  %s54_s27 = int_to_ptr.vmem [resolvable:$true] %s53_s27 }
  0x11   :  { %s667_s28 = scalar_lea.vmem %s27_s25, 256  ;;  %p672_p6 = scmp.lt.s32.totalorder %s27_s25, %s27_s25 }
  0x12   :  { %p668_p5 = scmp.ne.s32.totalorder %s27_s25, %s667_s28  ;;  %p673_p7 = scmp.lt.s32.totalorder %s667_s28, %s667_s28 }
  0x14   :  { %p674_p8 = por %p673_p7, %p672_p6 }
  0x16   :  { %p675_p9 = pnand %p674_p8, %p668_p5 }
  0x18   :  { %678 = shalt.err (!%p675_p9)
}
  0x19   :  { %29 = dma.hbm_to_vmem [thread:$0]  %s901_s0, 256, %s27_s25, [#allocation3]  }
  0x1a   :  { %s687_s12 = scalar_lea.vmem %s54_s27, 2048  ;;  %p692_p11 = scmp.lt.s32.totalorder %s54_s27, %s54_s27 }
  0x1b   :  { %p688_p10 = scmp.ne.s32.totalorder %s54_s27, %s687_s12  ;;  %p693_p12 = scmp.lt.s32.totalorder %s687_s12, %s687_s12 }
  0x1d   :  { %p694_p13 = por %p693_p12, %p692_p11 }
  0x1f   :  { %p695_p0 = pnand %p694_p13, %p688_p10 }
  0x21   :  { %698 = shalt.err (!%p695_p0)
}
  0x22   :  { %59 = dma.hbm_to_vmem [thread:$0]  %s906_s5, 2048, %s54_s27, [#allocation6], %s748_s20, %s748_s20, %s749_s21  }
  0x23   :  { %s752_s14 = smov [#allocation8]  }
  0x24   :  { %s71_s15 = sshll.u32 %s752_s14, 4  ;;  %s72_s15 = int_to_ptr.vmem [resolvable:$true] %s71_s15 }
  0x25   :  { %s707_s16 = scalar_lea.vmem %s72_s15, 2048  ;;  %p712_p2 = scmp.lt.s32.totalorder %s72_s15, %s72_s15 }
  0x26   :  { %p708_p1 = scmp.ne.s32.totalorder %s72_s15, %s707_s16  ;;  %p713_p3 = scmp.lt.s32.totalorder %s707_s16, %s707_s16 }
  0x28   :  { %p714_p4 = por %p713_p3, %p712_p2 }
  0x2a   :  { %p715_p5 = pnand %p714_p4, %p708_p1 }
  0x2c   :  { %718 = shalt.err (!%p715_p5)
}
  0x2d   :  { %77 = dma.hbm_to_vmem [thread:$0]  %s910_s9, 2048, %s72_s15, [#allocation9], %s748_s20, %s748_s20, %s749_s21  }
  0x2e   :  { %739 = dma.done.wait [#allocation3], 256  }
  0x2f   :  { %740 = vsyncadd [#allocation3], 4294967040 }
  0x30   :  { %741 = dma.done.wait [#allocation6], 6144  }
  0x31   :  { %742 = vsyncadd [#allocation6], 4294961152 }
  0x32   :  { %743 = dma.done.wait [#allocation9], 2048  }
  0x33   :  { %744 = vsyncadd [#allocation9], 4294965248  ;;  %v125_v0 = vld [vmem:[#allocation5 + $0xf8] sm:$0xff]  ;;  %v124_v2 = vld [vmem:[#allocation5 + $0xf0] sm:$0xff]  ;;  %v753_v34 = vmov 0.0   ;;  %vm754_vm0 = vmmov 0  }
  0x34   :  { %v109_v1 = vld [vmem:[#allocation5 + $0x78] sm:$0xff]  ;;  %487 = vmatprep.subr.mxu0 %v125_v0  ;;  %v108_v3 = vld [vmem:[#allocation5 + $0x70] sm:$0xff]  ;;  %v123_v4 = vld [vmem:[#allocation5 + $0xe8] sm:$0xff]  ;;  %556 = vmatprep.subr.mxu1 %v753_v34 }
  0x35   :  { %488 = vmatpush3.msra.mxu0 %v109_v1  ;;  %v107_v5 = vld [vmem:[#allocation5 + $0x68] sm:$0xff]  ;;  %v122_v6 = vld [vmem:[#allocation5 + $0xe0] sm:$0xff]  ;;  %v121_v8 = vld [vmem:[#allocation5 + $0xd8] sm:$0xff]  ;;  %588 = vmatprep.mubr.msk.f32.mxu1 %vm754_vm0, %v753_v34 }
  0x36   :  { %489 = vmatprep.subr.mxu0 %v124_v2  ;;  %v106_v7 = vld [vmem:[#allocation5 + $0x60] sm:$0xff]  ;;  %v105_v9 = vld [vmem:[#allocation5 + $0x58] sm:$0xff]  ;;  %v120_v10 = vld [vmem:[#allocation5 + $0xd0] sm:$0xff] }
  0x37   :  { %490 = vmatpush3.msra.mxu0 %v108_v3  ;;  %v104_v11 = vld [vmem:[#allocation5 + $0x50] sm:$0xff]  ;;  %v119_v12 = vld [vmem:[#allocation5 + $0xc8] sm:$0xff]  ;;  %v93_v13 = vld [vmem:[#allocation2 + $0x8] sm:$0xff] }
  0x38   :  { %491 = vmatprep.subr.mxu0 %v123_v4  ;;  %v103_v14 = vld [vmem:[#allocation5 + $0x48] sm:$0xff]  ;;  %197 = vmatprep.mubr.f32.mxu0 %v93_v13  ;;  %v118_v15 = vld [vmem:[#allocation5 + $0xc0] sm:$0xff]  ;;  %v117_v17 = vld [vmem:[#allocation5 + $0xb8] sm:$0xff] }
  0x39   :  { %492 = vmatpush3.msra.mxu0 %v107_v5  ;;  %v102_v16 = vld [vmem:[#allocation5 + $0x40] sm:$0xff]  ;;  %v101_v18 = vld [vmem:[#allocation5 + $0x38] sm:$0xff]  ;;  %v116_v19 = vld [vmem:[#allocation5 + $0xb0] sm:$0xff] }
  0x3a   :  { %493 = vmatprep.subr.mxu0 %v122_v6  ;;  %v100_v20 = vld [vmem:[#allocation5 + $0x30] sm:$0xff]  ;;  %v115_v21 = vld [vmem:[#allocation5 + $0xa8] sm:$0xff]  ;;  %v114_v23 = vld [vmem:[#allocation5 + $0xa0] sm:$0xff] }
  0x3b   :  { %494 = vmatpush3.msra.mxu0 %v106_v7  ;;  %v99_v22 = vld [vmem:[#allocation5 + $0x28] sm:$0xff]  ;;  %v98_v24 = vld [vmem:[#allocation5 + $0x20] sm:$0xff]  ;;  %v113_v25 = vld [vmem:[#allocation5 + $0x98] sm:$0xff] }
  0x3c   :  { %495 = vmatprep.subr.mxu0 %v121_v8  ;;  %v97_v26 = vld [vmem:[#allocation5 + $0x18] sm:$0xff]  ;;  %v112_v27 = vld [vmem:[#allocation5 + $0x90] sm:$0xff]  ;;  %v111_v29 = vld [vmem:[#allocation5 + $0x88] sm:$0xff] }
  0x3d   :  { %496 = vmatpush3.msra.mxu0 %v105_v9  ;;  %v96_v28 = vld [vmem:[#allocation5 + $0x10] sm:$0xff]  ;;  %v95_v30 = vld [vmem:[#allocation5 + $0x8] sm:$0xff]  ;;  %v110_v31 = vld [vmem:[#allocation5 + $0x80] sm:$0xff] }
  0x3e   :  { %497 = vmatprep.subr.mxu0 %v120_v10  ;;  %v94_v32 = vld [vmem:[#allocation5] sm:$0xff]  ;;  %v92_v33 = vld [vmem:[#allocation2] sm:$0xff]  ;;  %v257_v35 = vld [vmem:[#allocation7 + $0x78] sm:$0xff]  ;;  %v229_v10 = vlaneseq }
  0x3f   :  { %498 = vmatpush3.msra.mxu0 %v104_v11  ;;  %557 = vmatpush3.msra.mxu1 %v257_v35  ;;  %v256_v36 = vld [vmem:[#allocation7 + $0x70] sm:$0xff]  ;;  %v255_v37 = vld [vmem:[#allocation7 + $0x68] sm:$0xff]  ;;  %v254_v38 = vld [vmem:[#allocation7 + $0x60] sm:$0xff] }
  0x40   :  { %499 = vmatprep.subr.mxu0 %v119_v12  ;;  %558 = vmatprep.subr.mxu1 %v753_v34  ;;  %v253_v39 = vld [vmem:[#allocation7 + $0x58] sm:$0xff]  ;;  %v252_v40 = vld [vmem:[#allocation7 + $0x50] sm:$0xff]  ;;  %v251_v41 = vld [vmem:[#allocation7 + $0x48] sm:$0xff]  ;;  %v230_v11 = vshrl.u32 %v229_v10, 7 }
  0x41   :  { %500 = vmatpush3.msra.mxu0 %v103_v14  ;;  %559 = vmatpush3.msra.mxu1 %v256_v36  ;;  %v250_v42 = vld [vmem:[#allocation7 + $0x40] sm:$0xff]  ;;  %v249_v43 = vld [vmem:[#allocation7 + $0x38] sm:$0xff]  ;;  %v248_v44 = vld [vmem:[#allocation7 + $0x30] sm:$0xff] }
  0x42   :  { %501 = vmatprep.subr.mxu0 %v118_v15  ;;  %560 = vmatprep.subr.mxu1 %v753_v34  ;;  %v247_v45 = vld [vmem:[#allocation7 + $0x28] sm:$0xff]  ;;  %v246_v46 = vld [vmem:[#allocation7 + $0x20] sm:$0xff]  ;;  %v245_v47 = vld [vmem:[#allocation7 + $0x18] sm:$0xff]  ;;  %v862_v13 = vsub.s32 0, %v230_v11 }
  0x43   :  { %502 = vmatpush3.msra.mxu0 %v102_v16  ;;  %561 = vmatpush3.msra.mxu1 %v255_v37  ;;  %v244_v48 = vld [vmem:[#allocation7 + $0x10] sm:$0xff]  ;;  %v243_v49 = vld [vmem:[#allocation7 + $0x8] sm:$0xff]  ;;  %v242_v50 = vld [vmem:[#allocation7] sm:$0xff] }
  0x44   :  { %503 = vmatprep.subr.mxu0 %v117_v17  ;;  %562 = vmatprep.subr.mxu1 %v753_v34  ;;  %v484_v52 = vld [vmem:[%s903_s2] ss:$0 sm:$0xff]  ;;  %v377_v35 = vld [vmem:[#allocation8 + $0x20] sm:$0xff]  ;;  %v376_v36 = vld [vmem:[#allocation8 + $0x18] sm:$0xff] }
  0x45   :  { %504 = vmatpush3.msra.mxu0 %v101_v18  ;;  %563 = vmatpush3.msra.mxu1 %v254_v38  ;;  %v203_v12 = vld [vmem:[%s904_s3] sm:$0x1]  ;;  %v374_v38 = vld [vmem:[#allocation8 + $0x8] sm:$0xff] }
  0x46   :  { %505 = vmatprep.subr.mxu0 %v116_v19  ;;  %564 = vmatprep.subr.mxu1 %v753_v34  ;;  %v204_v16 = vld [vmem:[%s905_s4] sm:$0x1] }
  0x47   :  { %506 = vmatpush3.msra.mxu0 %v100_v20  ;;  %565 = vmatpush3.msra.mxu1 %v253_v39  ;;  %v375_v37 = vld [vmem:[#allocation8 + $0x10] sm:$0xff]  ;;  %v373_v39 = vld [vmem:[#allocation8] sm:$0xff] }
  0x48   :  { %507 = vmatprep.subr.mxu0 %v115_v21  ;;  %566 = vmatprep.subr.mxu1 %v753_v34 }
  0x49   :  { %508 = vmatpush3.msra.mxu0 %v99_v22  ;;  %567 = vmatpush3.msra.mxu1 %v252_v40  ;;  %v485_v40 = vld [vmem:[%s907_s6] ss:$0 sm:$0xff] }
  0x4a   :  { %509 = vmatprep.subr.mxu0 %v114_v23  ;;  %568 = vmatprep.subr.mxu1 %v753_v34  ;;  %v388_v23 = vld [vmem:[#allocation8 + $0x78] sm:$0xff] }
  0x4b   :  { %510 = vmatpush3.msra.mxu0 %v98_v24  ;;  %569 = vmatpush3.msra.mxu1 %v251_v41  ;;  %v387_v24 = vld [vmem:[#allocation8 + $0x70] sm:$0xff] }
  0x4c   :  { %511 = vmatprep.subr.mxu0 %v113_v25  ;;  %570 = vmatprep.subr.mxu1 %v753_v34  ;;  %v386_v25 = vld [vmem:[#allocation8 + $0x68] sm:$0xff] }
  0x4d   :  { %512 = vmatpush3.msra.mxu0 %v97_v26  ;;  %571 = vmatpush3.msra.mxu1 %v250_v42  ;;  %v385_v26 = vld [vmem:[#allocation8 + $0x60] sm:$0xff] }
  0x4e   :  { %513 = vmatprep.subr.mxu0 %v112_v27  ;;  %572 = vmatprep.subr.mxu1 %v753_v34  ;;  %v384_v27 = vld [vmem:[#allocation8 + $0x58] sm:$0xff] }
  0x4f   :  { %514 = vmatpush3.msra.mxu0 %v96_v28  ;;  %573 = vmatpush3.msra.mxu1 %v249_v43  ;;  %v383_v28 = vld [vmem:[#allocation8 + $0x50] sm:$0xff] }
  0x50   :  { %515 = vmatprep.subr.mxu0 %v111_v29  ;;  %574 = vmatprep.subr.mxu1 %v753_v34  ;;  %v382_v29 = vld [vmem:[#allocation8 + $0x48] sm:$0xff] }
  0x51   :  { %516 = vmatpush3.msra.mxu0 %v95_v30  ;;  %575 = vmatpush3.msra.mxu1 %v248_v44  ;;  %v381_v30 = vld [vmem:[#allocation8 + $0x40] sm:$0xff] }
  0x52   :  { %517 = vmatprep.subr.mxu0 %v110_v31  ;;  %576 = vmatprep.subr.mxu1 %v753_v34  ;;  %v380_v31 = vld [vmem:[#allocation8 + $0x38] sm:$0xff] }
  0x53   :  { %518 = vmatpush3.msra.mxu0 %v94_v32  ;;  %577 = vmatpush3.msra.mxu1 %v247_v45  ;;  %v379_v32 = vld [vmem:[#allocation8 + $0x30] sm:$0xff] }
  0x54   :  { %198 = vmatmul.mubr.f32.vlgmr.msra.gmra.mxu0 %v92_v33  ;;  %591 = vmatprep.subr.mxu0 %v753_v34  ;;  %v378_v33 = vld [vmem:[#allocation8 + $0x28] sm:$0xff] }
  0x55   :  { %623 = vmatprep.mubr.msk.f32.mxu0 %vm754_vm0, %v753_v34  ;;  %578 = vmatprep.subr.mxu1 %v753_v34 }
  0x56   :  { %579 = vmatpush3.msra.mxu1 %v246_v46  ;;  %592 = vmatpush3.msra.mxu0 %v388_v23 }
  0x57   :  { %580 = vmatprep.subr.mxu1 %v753_v34  ;;  %593 = vmatprep.subr.mxu0 %v753_v34 }
  0x58   :  { %581 = vmatpush3.msra.mxu1 %v245_v47  ;;  %594 = vmatpush3.msra.mxu0 %v387_v24 }
  0x59   :  { %582 = vmatprep.subr.mxu1 %v753_v34  ;;  %595 = vmatprep.subr.mxu0 %v753_v34 }
  0x5a   :  { %583 = vmatpush3.msra.mxu1 %v244_v48  ;;  %596 = vmatpush3.msra.mxu0 %v386_v25 }
  0x5b   :  { %584 = vmatprep.subr.mxu1 %v753_v34  ;;  %597 = vmatprep.subr.mxu0 %v753_v34 }
  0x5c   :  { %585 = vmatpush3.msra.mxu1 %v243_v49  ;;  %598 = vmatpush3.msra.mxu0 %v385_v26 }
  0x5d   :  { %586 = vmatprep.subr.mxu1 %v753_v34  ;;  %599 = vmatprep.subr.mxu0 %v753_v34 }
  0x5e   :  { %587 = vmatpush3.msra.mxu1 %v242_v50  ;;  %600 = vmatpush3.msra.mxu0 %v384_v27 }
  0x5f   :  { %601 = vmatprep.subr.mxu0 %v753_v34 }
  0x60   :  { %602 = vmatpush3.msra.mxu0 %v383_v28 }
  0x61   :  { %603 = vmatprep.subr.mxu0 %v753_v34 }
  0x62   :  { %604 = vmatpush3.msra.mxu0 %v382_v29 }
  0x63   :  { %605 = vmatprep.subr.mxu0 %v753_v34 }
  0x64   :  { %606 = vmatpush3.msra.mxu0 %v381_v30 }
  0x65   :  { %607 = vmatprep.subr.mxu0 %v753_v34 }
  0x66   :  { %608 = vmatpush3.msra.mxu0 %v380_v31 }
  0x67   :  { %609 = vmatprep.subr.mxu0 %v753_v34 }
  0x68   :  { %610 = vmatpush3.msra.mxu0 %v379_v32 }
  0x69   :  { %611 = vmatprep.subr.mxu0 %v753_v34 }
  0x6a   :  { %612 = vmatpush3.msra.mxu0 %v378_v33 }
  0x6b   :  { %613 = vmatprep.subr.mxu0 %v753_v34 }
  0x6c   :  { %614 = vmatpush3.msra.mxu0 %v377_v35 }
  0x6d   :  { %615 = vmatprep.subr.mxu0 %v753_v34 }
  0x6e   :  { %616 = vmatpush3.msra.mxu0 %v376_v36 }
  0x6f   :  { %617 = vmatprep.subr.mxu0 %v753_v34 }
  0x70   :  { %618 = vmatpush3.msra.mxu0 %v375_v37 }
  0x71   :  { %619 = vmatprep.subr.mxu0 %v753_v34 }
  0x72   :  { %620 = vmatpush3.msra.mxu0 %v374_v38 }
  0x73   :  { %621 = vmatprep.subr.mxu0 %v753_v34 }
  0x74   :  { %622 = vmatpush3.msra.mxu0 %v373_v39 }
 0x114   :  { %v519_v51 = vpop.f32.mrf.mxu0 }
 0x116   :  { %v520_v53 = vpop.f32.mrf.mxu0 }
 0x117   :  { %v521_v54 = vadd.f32 %v520_v53, %v519_v51 }
 0x119   :  { %v200_v55 = vadd.f32 %v521_v54, %v484_v52 }
 0x11b   :  { %v205_v56 = vmax.f32 %v200_v55, 0.0 }
 0x11d   :  { %v206_v57 = vrot.slane %v205_v56, 4 }
 0x11f   :  { %v207_v58 = vadd.f32 %v206_v57, %v205_v56 }
 0x121   :  { %v208_v59 = vrot.slane %v207_v58, 2 }
 0x123   :  { %v209_v60 = vadd.f32 %v208_v59, %v207_v58 }
 0x125   :  { %v210_v61 = vrot.slane %v209_v60, 1 }
 0x127   :  { %v211_v62 = vadd.f32 %v210_v61, %v209_v60  ;;  %v335_v61 = vld [vmem:[%s908_s7] sm:$0x1]  ;;  %s755_s7 = smov [#allocation10]  }
 0x128   :  { %s473_s26 = sshll.u32 %s755_s7, 4  ;;  %s474_s26 = int_to_ptr.vmem [resolvable:$true] %s473_s26 }
 0x129   :  { %v213_v63 = vmul.f32 0.125, %v211_v62  ;;  %p724_p7 = scmp.lt.s32.totalorder %s474_s26, %s474_s26 }
 0x12b   :  { %v214_v0 = vsub.f32 %v205_v56, %v213_v63 }
 0x12d   :  { %v215_v1 = vmul.f32 %v214_v0, %v214_v0  ;;  %v336_v0 = vld [vmem:[%s909_s8] sm:$0x1]  ;;  %s719_s8 = scalar_lea.vmem %s474_s26, 128 }
 0x12e   :  { %p720_p6 = scmp.ne.s32.totalorder %s474_s26, %s719_s8  ;;  %p725_p8 = scmp.lt.s32.totalorder %s719_s8, %s719_s8 }
 0x12f   :  { %v216_v2 = vrot.slane %v215_v1, 4 }
 0x130   :  { %p726_p9 = por %p725_p8, %p724_p7 }
 0x131   :  { %v217_v3 = vadd.f32 %v216_v2, %v215_v1 }
 0x132   :  { %p727_p10 = pnand %p726_p9, %p720_p6 }
 0x133   :  { %v218_v4 = vrot.slane %v217_v3, 2 }
 0x135   :  { %v219_v5 = vadd.f32 %v218_v4, %v217_v3 }
 0x137   :  { %v220_v6 = vrot.slane %v219_v5, 1 }
 0x139   :  { %v221_v7 = vadd.f32 %v220_v6, %v219_v5 }
 0x13b   :  { %v222_v8 = vmul.f32 0.125, %v221_v7  ;;  %v486_v7 = vld [vmem:[%s911_s10] ss:$0 sm:$0xff] }
 0x13d   :  { %v223_v9 = vadd.f32 1e-05, %v222_v8 }
 0x13f   :  { %635 = vrsqrt.f32 %v223_v9 }
 0x14c   :  { %v636_v14 = vpop.eup %635 }
 0x14d   :  { %v225_v15 = vmul.f32 %v636_v14, %v203_v12 }
 0x14f   :  { %v226_v17 = vmul.f32 %v225_v15, %v213_v63  ;;  %v232_v18 = vrot.slane %v225_v15, %v862_v13 }
 0x151   :  { %v227_v19 = vsub.f32 %v204_v16, %v226_v17  ;;  %v234_v20 = vmul.f32 %v232_v18, %v205_v56 }
 0x153   :  { %v239_v21 = vrot.slane %v227_v19, %v862_v13 }
 0x155   :  { %v241_v22 = vadd.f32 %v239_v21, %v234_v20 }
 0x157   :  { %589 = vmatmul.mubr.f32.vlgmr.msra.gmra.mxu1 %v241_v22 }
 0x217   :  { %v331_v41 = vpop.f32.mrf.mxu1 }
 0x218   :  { %v332_v42 = vadd.f32 %v485_v40, %v331_v41 }
 0x219   :  { %v590_v43 = vpop.f32.mrf.mxu1 }
 0x21a   :  { %v337_v44 = vmax.f32 %v332_v42, 0.0 }
 0x21c   :  { %v338_v45 = vrot.slane %v337_v44, 4 }
 0x21e   :  { %v339_v46 = vadd.f32 %v338_v45, %v337_v44 }
 0x220   :  { %v340_v47 = vrot.slane %v339_v46, 2 }
 0x222   :  { %v341_v48 = vadd.f32 %v340_v47, %v339_v46 }
 0x224   :  { %v342_v49 = vrot.slane %v341_v48, 1 }
 0x226   :  { %v343_v50 = vadd.f32 %v342_v49, %v341_v48 }
 0x228   :  { %v344_v51 = vmul.f32 0.125, %v343_v50 }
 0x22a   :  { %v345_v52 = vsub.f32 %v337_v44, %v344_v51 }
 0x22c   :  { %v346_v53 = vmul.f32 %v345_v52, %v345_v52 }
 0x22e   :  { %v347_v54 = vrot.slane %v346_v53, 4 }
 0x230   :  { %v348_v34 = vadd.f32 %v347_v54, %v346_v53 }
 0x232   :  { %v349_v55 = vrot.slane %v348_v34, 2 }
 0x234   :  { %v350_v56 = vadd.f32 %v349_v55, %v348_v34 }
 0x236   :  { %v351_v57 = vrot.slane %v350_v56, 1 }
 0x238   :  { %v352_v58 = vadd.f32 %v351_v57, %v350_v56 }
 0x23a   :  { %v353_v59 = vmul.f32 0.125, %v352_v58 }
 0x23c   :  { %v354_v60 = vadd.f32 1e-05, %v353_v59 }
 0x23e   :  { %637 = vrsqrt.f32 %v354_v60 }
 0x24b   :  { %v638_v62 = vpop.eup %637 }
 0x24c   :  { %v356_v63 = vmul.f32 %v638_v62, %v335_v61 }
 0x24e   :  { %v357_v1 = vmul.f32 %v356_v63, %v344_v51  ;;  %v363_v2 = vrot.slane %v356_v63, %v862_v13 }
 0x250   :  { %v358_v3 = vsub.f32 %v336_v0, %v357_v1  ;;  %v365_v4 = vmul.f32 %v363_v2, %v337_v44 }
 0x252   :  { %v370_v5 = vrot.slane %v358_v3, %v862_v13 }
 0x254   :  { %v372_v6 = vadd.f32 %v370_v5, %v365_v4 }
 0x256   :  { %624 = vmatmul.mubr.f32.vlgmr.msra.gmra.mxu0 %v372_v6 }
 0x316   :  { %v462_v8 = vpop.f32.mrf.mxu0 }
 0x317   :  { %v463_v9 = vadd.f32 %v486_v7, %v462_v8 }
 0x318   :  { %v625_v10 = vpop.f32.mrf.mxu0 }
 0x319   :  { %466 = vst [vmem:[#allocation10] sm:$0xff] %v463_v9 }
 0x31a   :  { %730 = shalt.err (!%p727_p10)
}
 0x31b   :  { %476 = dma.vmem_to_hbm [thread:$0]  %s474_s26, 128, %s912_s11, [#allocation4]  }
 0x31c   :  { %745 = dma.done.wait [#allocation4], 128  }
 0x31d   :  { %746 = vsyncadd [#allocation4], 4294967168 }
 0x31e   :  { %480 = vsyncpa [#allocation3], 1 }
 0x31f   :  { %481 = vsyncpa [#allocation6], 1 }
 0x320   :  { %482 = vsyncpa [#allocation9], 1 }
 0x321   :  { %483 = vsyncpa [#allocation4], 1 }

</bundles_post_ra>
